<compile_context>
chip_gen: v5e
topology: v5e:2x2
jax: 0.10.0
libtpu: 0.0.40
codegen_flags: <defaults>
</compile_context>

<pallas_src>
import math

import jax
import jax.numpy as jnp
from jax import lax
from jax.experimental import pallas as pl
from jax.experimental.pallas import tpu as pltpu

_LANES = 128
_SUBLANES = 8
_TARGET_BLOCK_SUBLANES = 2048   # K * tile_s ~= 2048 -> 1 MiB per pipelined buffer
_MAX_BLOCK_SUBLANES = 4096      # hard cap: 2 MiB per buffer


def _round_up(a, b):
    return -(-a // b) * b


def _tensorcores_per_chip():
    """Best-effort detection; only affects tile sizing, never correctness."""
    try:
        kind = jax.devices()[0].device_kind.lower()
    except Exception:
        return 1
    return 2 if "v7" in kind else 1


def _snn_block_kernel(params_ref, x_ref, spk2_ref, mem2_rec_ref, mem1_ref, mem2_ref):
    """One (batch-tile, time-block) grid step; loops over K timesteps in-kernel."""
    tb = pl.program_id(1)

    @pl.when(tb == 0)
    def _init():
        mem1_ref[...] = jnp.zeros_like(mem1_ref)
        mem2_ref[...] = jnp.zeros_like(mem2_ref)

    # Scalars from SMEM (scalar prefetch): [w1, b1, w2, b2, beta, threshold]
    w1 = params_ref[0]
    b1 = params_ref[1]
    w2 = params_ref[2]
    b2 = params_ref[3]
    beta = params_ref[4]
    thr = params_ref[5]

    k_steps = x_ref.shape[0]

    def step(k, carry):
        x_t = x_ref[k]                                # (tile_s, 128) f32

        # fc1: Linear(1, 1) == scalar affine (bias fused).
        cur1 = x_t * w1 + b1

        # lif1: Leaky, reset-by-subtraction, Heaviside spike (where-form, no casts).
        m1_prev = mem1_ref[...]
        base1 = beta * m1_prev + cur1
        m1 = jnp.where(m1_prev > thr, base1 - thr, base1)
        mem1_ref[...] = m1
        spk1 = jnp.where(m1 > thr, 1.0, 0.0)

        # fc2: Linear(1, 1)
        cur2 = spk1 * w2 + b2

        # lif2
        m2_prev = mem2_ref[...]
        base2 = beta * m2_prev + cur2
        m2 = jnp.where(m2_prev > thr, base2 - thr, base2)
        mem2_ref[...] = m2
        spk2 = jnp.where(m2 > thr, 1.0, 0.0)

        spk2_ref[k] = spk2.astype(spk2_ref.dtype)
        mem2_rec_ref[k] = m2.astype(mem2_rec_ref.dtype)
        return carry

    lax.fori_loop(0, k_steps, step, 0, unroll=bool(k_steps <= 16))


def energy_efficiency_net_forward(x, w1, b1, w2, b2, beta,
                                  num_timesteps=None, threshold=1.0):
    """Forward pass of EnergyEfficiencyNetTest1.

    x:  (T, B, 1) float32 time-major input
    w1, b1: fc1 params, shapes (1, 1), (1,)
    w2, b2: fc2 params, shapes (1, 1), (1,)
    Returns (spk2_rec, mem2_rec), each shaped like x.
    """
    timesteps = num_timesteps if num_timesteps is not None else x.shape[0]
    assert x.shape[0] == timesteps, "x.shape[0] must equal the number of timesteps"

    orig_shape = x.shape
    T = x.shape[0]
    x2 = x.reshape(T, -1).astype(jnp.float32)          # (T, N), N = B * 1
    n = x2.shape[1]

    # ---- Batch-tile sizing: lane-dense (sublane, 128) tiles ----------------
    s = _round_up(max(1, -(-n // _LANES)), _SUBLANES)   # padded sublanes

    num_tc = _tensorcores_per_chip()
    if num_tc >= 2 and s >= 2 * _SUBLANES:
        # v7x: >=2 batch tiles so the 'parallel' axis shards across both TCs.
        tile_s = _round_up(-(-s // 2), _SUBLANES)
        num_batch_tiles = 2
    else:
        # Single-TC chips: one big tile (extra tiles = pure sequential overhead).
        tile_s = min(s, _MAX_BLOCK_SUBLANES)
        num_batch_tiles = -(-s // tile_s)
    s = tile_s * num_batch_tiles
    n_pad = s * _LANES

    # ---- Time-block sizing: ~1 MiB per pipelined buffer --------------------
    k_block = max(1, _TARGET_BLOCK_SUBLANES // tile_s)
    k_block = min(k_block, max(1, _MAX_BLOCK_SUBLANES // tile_s))
    k_block = min(k_block, T)
    t_pad = _round_up(T, k_block)
    num_time_blocks = t_pad // k_block

    x_p = jnp.pad(x2, ((0, t_pad - T), (0, n_pad - n))).reshape(t_pad, s, _LANES)

    beta_c = jnp.clip(jnp.asarray(beta, jnp.float32), 0.0, 1.0)  # Leaky clamps beta
    params = jnp.concatenate([
        jnp.reshape(w1, (-1,)).astype(jnp.float32)[:1],
        jnp.reshape(b1, (-1,)).astype(jnp.float32)[:1],
        jnp.reshape(w2, (-1,)).astype(jnp.float32)[:1],
        jnp.reshape(b2, (-1,)).astype(jnp.float32)[:1],
        jnp.reshape(beta_c, (1,)),
        jnp.full((1,), threshold, dtype=jnp.float32),
    ])

    # index_maps receive the scalar-prefetch ref as a trailing positional arg.
    tile_spec = pl.BlockSpec((k_block, tile_s, _LANES), lambda bt, tb, p: (tb, bt, 0))

    block_bytes = k_block * tile_s * _LANES * 4
    scratch_bytes = tile_s * _LANES * 4
    vmem_needed = 3 * 2 * block_bytes + 2 * scratch_bytes
    vmem_limit = int(min(max(vmem_needed + (4 << 20), 16 << 20), 48 << 20))

    flops = 10 * t_pad * n_pad
    bytes_accessed = 4 * 3 * t_pad * n_pad  # read x, write spk2 + mem2

    spk2_p, mem2_p = pl.pallas_call(
        _snn_block_kernel,
        out_shape=(
            jax.ShapeDtypeStruct((t_pad, s, _LANES), jnp.float32),
            jax.ShapeDtypeStruct((t_pad, s, _LANES), jnp.float32),
        ),
        grid_spec=pltpu.PrefetchScalarGridSpec(
            num_scalar_prefetch=1,                     # params -> SMEM, pre-grid
            grid=(num_batch_tiles, num_time_blocks),   # time innermost (recurrent)
            in_specs=[tile_spec],                      # x
            out_specs=[tile_spec, tile_spec],          # spk2, mem2 records
            scratch_shapes=[
                pltpu.VMEM((tile_s, _LANES), jnp.float32),  # mem1 (resident state)
                pltpu.VMEM((tile_s, _LANES), jnp.float32),  # mem2 (resident state)
            ],
        ),
        compiler_params=pltpu.CompilerParams(
            dimension_semantics=("parallel", "arbitrary"),
            vmem_limit_bytes=vmem_limit,
        ),
        cost_estimate=pl.CostEstimate(
            flops=flops, transcendentals=0, bytes_accessed=bytes_accessed),
    )(params, x_p)

    spk2 = spk2_p.reshape(t_pad, n_pad)[:T, :n].reshape(orig_shape)
    mem2 = mem2_p.reshape(t_pad, n_pad)[:T, :n].reshape(orig_shape)
    return spk2, mem2


def init_linear_params(key, in_features, out_features, dtype=jnp.float32):
    """Matches nn.Linear.reset_parameters: U(-1/sqrt(fan_in), 1/sqrt(fan_in))."""
    k_w, k_b = jax.random.split(key)
    bound = 1.0 / math.sqrt(in_features) if in_features > 0 else 0.0
    weight = jax.random.uniform(k_w, (out_features, in_features), dtype=dtype,
                                minval=-bound, maxval=bound)
    bias = jax.random.uniform(k_b, (out_features,), dtype=dtype,
                              minval=-bound, maxval=bound)
    return weight, bias


def reference_forward(x, w1, b1, w2, b2, beta, threshold=1.0):
    """Pure-JAX reference mirroring the PyTorch/snntorch forward."""
    beta_c = jnp.clip(jnp.asarray(beta, jnp.float32), 0.0, 1.0)
    mem1 = jnp.zeros_like(x[0])
    mem2 = jnp.zeros_like(x[0])
    spk2_rec, mem2_rec = [], []
    for t in range(x.shape[0]):
        cur1 = x[t] * w1[0, 0] + b1[0]
        reset1 = (mem1 > threshold).astype(x.dtype)
        mem1 = beta_c * mem1 + cur1 - reset1 * threshold
        spk1 = (mem1 > threshold).astype(x.dtype)
        cur2 = spk1 * w2[0, 0] + b2[0]
        reset2 = (mem2 > threshold).astype(x.dtype)
        mem2 = beta_c * mem2 + cur2 - reset2 * threshold
        spk2 = (mem2 > threshold).astype(x.dtype)
        spk2_rec.append(spk2)
        mem2_rec.append(mem2)
    return jnp.stack(spk2_rec), jnp.stack(mem2_rec)


if __name__ == "__main__":
    key = jax.random.PRNGKey(0)
    k_x, k_p1, k_p2 = jax.random.split(key, 3)

    timesteps, batch, features = 8, 2, 1
    beta = 0.9

    # Time-major input (T, B, 1), scaled so the LIF layers cross threshold.
    x = 2.0 * jax.random.normal(k_x, (timesteps, batch, features), dtype=jnp.float32)

    w1, b1 = init_linear_params(k_p1, 1, 1)
    w2, b2 = init_linear_params(k_p2, 1, 1)

    spk2, mem2 = energy_efficiency_net_forward(
        x, w1, b1, w2, b2, beta, num_timesteps=timesteps)
    spk2, mem2 = jax.block_until_ready((spk2, mem2))

    spk2_ref, mem2_ref = reference_forward(x, w1, b1, w2, b2, beta)

    assert spk2.shape == (timesteps, batch, features)
    assert mem2.shape == (timesteps, batch, features)
    assert jnp.allclose(mem2, mem2_ref, atol=1e-5, rtol=1e-5)
    assert jnp.allclose(spk2, spk2_ref, atol=1e-5, rtol=1e-5)

    print("KERNEL_OK")
</pallas_src>

<mosaic_0001>
module attributes {stable_mosaic.version = 11 : i64} {
  func.func @_snn_block_kernel(%arg0: i32, %arg1: i32, %arg2: memref<6xf32, #tpu.memory_space<smem>>, %arg3: memref<8x8x128xf32, #tpu.memory_space<vmem>>, %arg4: memref<8x8x128xf32, #tpu.memory_space<vmem>>, %arg5: memref<8x8x128xf32, #tpu.memory_space<vmem>>, %arg6: memref<8x128xf32, #tpu.memory_space<vmem>>, %arg7: memref<8x128xf32, #tpu.memory_space<vmem>>) attributes {dimension_semantics = [#tpu.dimension_semantics<parallel>, #tpu.dimension_semantics<arbitrary>], iteration_bounds = array<i64: 1, 1>, scalar_prefetch = 1 : i64, scratch_operands = 2 : i64, tpu.core_type = #tpu.core_type<tc>, window_params = [{transform_indices = @transform_0, window_bounds = array<i64: 8, 8, 128>}, {transform_indices = @transform_1, window_bounds = array<i64: 8, 8, 128>}, {transform_indices = @transform_2, window_bounds = array<i64: 8, 8, 128>}]} {
    %c0_i32 = arith.constant 0 : i32
    %0 = arith.cmpi eq, %arg1, %c0_i32 : i32
    %1 = arith.extui %0 : i1 to i32
    %c0_i32_0 = arith.constant 0 : i32
    %2 = arith.cmpi ne, %1, %c0_i32_0 : i32
    scf.if %2 {
      %cst_145 = arith.constant 0.000000e+00 : f32
      %401 = vector.broadcast %cst_145 : f32 to vector<8x128xf32>
      %c0_146 = arith.constant 0 : index
      %c0_147 = arith.constant 0 : index
      %402 = vector.load %arg6[%c0_146, %c0_147] : memref<8x128xf32, #tpu.memory_space<vmem>>, vector<8x128xf32>
      tpu.vector_store %arg6[%c0_146, %c0_147], %401 {strides = array<i32>} : memref<8x128xf32, #tpu.memory_space<vmem>>, vector<8x128xf32>,
      %cst_148 = arith.constant 0.000000e+00 : f32
      %403 = vector.broadcast %cst_148 : f32 to vector<8x128xf32>
      %c0_149 = arith.constant 0 : index
      %c0_150 = arith.constant 0 : index
      %404 = vector.load %arg7[%c0_149, %c0_150] : memref<8x128xf32, #tpu.memory_space<vmem>>, vector<8x128xf32>
      tpu.vector_store %arg7[%c0_149, %c0_150], %403 {strides = array<i32>} : memref<8x128xf32, #tpu.memory_space<vmem>>, vector<8x128xf32>,
    } else {
    }
    %c0 = arith.constant 0 : index
    %3 = memref.load %arg2[%c0] : memref<6xf32, #tpu.memory_space<smem>>
    %c1 = arith.constant 1 : index
    %4 = memref.load %arg2[%c1] : memref<6xf32, #tpu.memory_space<smem>>
    %c2 = arith.constant 2 : index
    %5 = memref.load %arg2[%c2] : memref<6xf32, #tpu.memory_space<smem>>
    %c3 = arith.constant 3 : index
    %6 = memref.load %arg2[%c3] : memref<6xf32, #tpu.memory_space<smem>>
    %c4 = arith.constant 4 : index
    %7 = memref.load %arg2[%c4] : memref<6xf32, #tpu.memory_space<smem>>
    %c5 = arith.constant 5 : index
    %8 = memref.load %arg2[%c5] : memref<6xf32, #tpu.memory_space<smem>>
    %c0_i32_1 = arith.constant 0 : i32
    %9 = arith.index_cast %c0_i32_1 : i32 to index
    %c0_2 = arith.constant 0 : index
    %c0_3 = arith.constant 0 : index
    %10 = vector.load %arg3[%9, %c0_2, %c0_3] : memref<8x8x128xf32, #tpu.memory_space<vmem>>, vector<1x8x128xf32>
    %11 = vector.shape_cast %10 : vector<1x8x128xf32> to vector<8x128xf32>
    %12 = vector.broadcast %3 : f32 to vector<8x128xf32>
    %13 = arith.mulf %11, %12 : vector<8x128xf32>
    %14 = vector.broadcast %4 : f32 to vector<8x128xf32>
    %15 = arith.addf %13, %14 : vector<8x128xf32>
    %c0_4 = arith.constant 0 : index
    %c0_5 = arith.constant 0 : index
    %16 = vector.load %arg6[%c0_4, %c0_5] : memref<8x128xf32, #tpu.memory_space<vmem>>, vector<8x128xf32>
    %17 = vector.broadcast %7 : f32 to vector<8x128xf32>
    %18 = arith.mulf %17, %16 : vector<8x128xf32>
    %19 = arith.addf %18, %15 : vector<8x128xf32>
    %20 = vector.broadcast %8 : f32 to vector<8x128xf32>
    %21 = arith.cmpf ogt, %16, %20 : vector<8x128xf32>
    %22 = vector.broadcast %8 : f32 to vector<8x128xf32>
    %23 = arith.subf %19, %22 : vector<8x128xf32>
    %24 = arith.select %21, %23, %19 : vector<8x128xi1>, vector<8x128xf32>
    %c0_6 = arith.constant 0 : index
    %c0_7 = arith.constant 0 : index
    %25 = vector.load %arg6[%c0_6, %c0_7] : memref<8x128xf32, #tpu.memory_space<vmem>>, vector<8x128xf32>
    tpu.vector_store %arg6[%c0_6, %c0_7], %24 {strides = array<i32>} : memref<8x128xf32, #tpu.memory_space<vmem>>, vector<8x128xf32>,
    %26 = vector.broadcast %8 : f32 to vector<8x128xf32>
    %27 = arith.cmpf ogt, %24, %26 : vector<8x128xf32>
    %cst = arith.constant 1.000000e+00 : f32
    %cst_8 = arith.constant 0.000000e+00 : f32
    %28 = vector.broadcast %cst : f32 to vector<8x128xf32>
    %29 = vector.broadcast %cst_8 : f32 to vector<8x128xf32>
    %30 = arith.select %27, %28, %29 : vector<8x128xi1>, vector<8x128xf32>
    %31 = vector.broadcast %5 : f32 to vector<8x128xf32>
    %32 = arith.mulf %30, %31 : vector<8x128xf32>
    %33 = vector.broadcast %6 : f32 to vector<8x128xf32>
    %34 = arith.addf %32, %33 : vector<8x128xf32>
    %c0_9 = arith.constant 0 : index
    %c0_10 = arith.constant 0 : index
    %35 = vector.load %arg7[%c0_9, %c0_10] : memref<8x128xf32, #tpu.memory_space<vmem>>, vector<8x128xf32>
    %36 = vector.broadcast %7 : f32 to vector<8x128xf32>
    %37 = arith.mulf %36, %35 : vector<8x128xf32>
    %38 = arith.addf %37, %34 : vector<8x128xf32>
    %39 = vector.broadcast %8 : f32 to vector<8x128xf32>
    %40 = arith.cmpf ogt, %35, %39 : vector<8x128xf32>
    %41 = vector.broadcast %8 : f32 to vector<8x128xf32>
    %42 = arith.subf %38, %41 : vector<8x128xf32>
    %43 = arith.select %40, %42, %38 : vector<8x128xi1>, vector<8x128xf32>
    %c0_11 = arith.constant 0 : index
    %c0_12 = arith.constant 0 : index
    %44 = vector.load %arg7[%c0_11, %c0_12] : memref<8x128xf32, #tpu.memory_space<vmem>>, vector<8x128xf32>
    tpu.vector_store %arg7[%c0_11, %c0_12], %43 {strides = array<i32>} : memref<8x128xf32, #tpu.memory_space<vmem>>, vector<8x128xf32>,
    %45 = vector.broadcast %8 : f32 to vector<8x128xf32>
    %46 = arith.cmpf ogt, %43, %45 : vector<8x128xf32>
    %cst_13 = arith.constant 1.000000e+00 : f32
    %cst_14 = arith.constant 0.000000e+00 : f32
    %47 = vector.broadcast %cst_13 : f32 to vector<8x128xf32>
    %48 = vector.broadcast %cst_14 : f32 to vector<8x128xf32>
    %49 = arith.select %46, %47, %48 : vector<8x128xi1>, vector<8x128xf32>
    %50 = arith.index_cast %c0_i32_1 : i32 to index
    %c0_15 = arith.constant 0 : index
    %c0_16 = arith.constant 0 : index
    %51 = vector.load %arg4[%50, %c0_15, %c0_16] : memref<8x8x128xf32, #tpu.memory_space<vmem>>, vector<1x8x128xf32>
    %52 = vector.shape_cast %51 : vector<1x8x128xf32> to vector<8x128xf32>
    %53 = vector.shape_cast %49 : vector<8x128xf32> to vector<1x8x128xf32>
    tpu.vector_store %arg4[%50, %c0_15, %c0_16], %53 {strides = array<i32>} : memref<8x8x128xf32, #tpu.memory_space<vmem>>, vector<1x8x128xf32>,
    %54 = arith.index_cast %c0_i32_1 : i32 to index
    %c0_17 = arith.constant 0 : index
    %c0_18 = arith.constant 0 : index
    %55 = vector.load %arg5[%54, %c0_17, %c0_18] : memref<8x8x128xf32, #tpu.memory_space<vmem>>, vector<1x8x128xf32>
    %56 = vector.shape_cast %55 : vector<1x8x128xf32> to vector<8x128xf32>
    %57 = vector.shape_cast %43 : vector<8x128xf32> to vector<1x8x128xf32>
    tpu.vector_store %arg5[%54, %c0_17, %c0_18], %57 {strides = array<i32>} : memref<8x8x128xf32, #tpu.memory_space<vmem>>, vector<1x8x128xf32>,
    %c1_i32 = arith.constant 1 : i32
    %58 = arith.index_cast %c1_i32 : i32 to index
    %c0_19 = arith.constant 0 : index
    %c0_20 = arith.constant 0 : index
    %59 = vector.load %arg3[%58, %c0_19, %c0_20] : memref<8x8x128xf32, #tpu.memory_space<vmem>>, vector<1x8x128xf32>
    %60 = vector.shape_cast %59 : vector<1x8x128xf32> to vector<8x128xf32>
    %61 = vector.broadcast %3 : f32 to vector<8x128xf32>
    %62 = arith.mulf %60, %61 : vector<8x128xf32>
    %63 = vector.broadcast %4 : f32 to vector<8x128xf32>
    %64 = arith.addf %62, %63 : vector<8x128xf32>
    %c0_21 = arith.constant 0 : index
    %c0_22 = arith.constant 0 : index
    %65 = vector.load %arg6[%c0_21, %c0_22] : memref<8x128xf32, #tpu.memory_space<vmem>>, vector<8x128xf32>
    %66 = vector.broadcast %7 : f32 to vector<8x128xf32>
    %67 = arith.mulf %66, %65 : vector<8x128xf32>
    %68 = arith.addf %67, %64 : vector<8x128xf32>
    %69 = vector.broadcast %8 : f32 to vector<8x128xf32>
    %70 = arith.cmpf ogt, %65, %69 : vector<8x128xf32>
    %71 = vector.broadcast %8 : f32 to vector<8x128xf32>
    %72 = arith.subf %68, %71 : vector<8x128xf32>
    %73 = arith.select %70, %72, %68 : vector<8x128xi1>, vector<8x128xf32>
    %c0_23 = arith.constant 0 : index
    %c0_24 = arith.constant 0 : index
    %74 = vector.load %arg6[%c0_23, %c0_24] : memref<8x128xf32, #tpu.memory_space<vmem>>, vector<8x128xf32>
    tpu.vector_store %arg6[%c0_23, %c0_24], %73 {strides = array<i32>} : memref<8x128xf32, #tpu.memory_space<vmem>>, vector<8x128xf32>,
    %75 = vector.broadcast %8 : f32 to vector<8x128xf32>
    %76 = arith.cmpf ogt, %73, %75 : vector<8x128xf32>
    %cst_25 = arith.constant 1.000000e+00 : f32
    %cst_26 = arith.constant 0.000000e+00 : f32
    %77 = vector.broadcast %cst_25 : f32 to vector<8x128xf32>
    %78 = vector.broadcast %cst_26 : f32 to vector<8x128xf32>
    %79 = arith.select %76, %77, %78 : vector<8x128xi1>, vector<8x128xf32>
    %80 = vector.broadcast %5 : f32 to vector<8x128xf32>
    %81 = arith.mulf %79, %80 : vector<8x128xf32>
    %82 = vector.broadcast %6 : f32 to vector<8x128xf32>
    %83 = arith.addf %81, %82 : vector<8x128xf32>
    %c0_27 = arith.constant 0 : index
    %c0_28 = arith.constant 0 : index
    %84 = vector.load %arg7[%c0_27, %c0_28] : memref<8x128xf32, #tpu.memory_space<vmem>>, vector<8x128xf32>
    %85 = vector.broadcast %7 : f32 to vector<8x128xf32>
    %86 = arith.mulf %85, %84 : vector<8x128xf32>
    %87 = arith.addf %86, %83 : vector<8x128xf32>
    %88 = vector.broadcast %8 : f32 to vector<8x128xf32>
    %89 = arith.cmpf ogt, %84, %88 : vector<8x128xf32>
    %90 = vector.broadcast %8 : f32 to vector<8x128xf32>
    %91 = arith.subf %87, %90 : vector<8x128xf32>
    %92 = arith.select %89, %91, %87 : vector<8x128xi1>, vector<8x128xf32>
    %c0_29 = arith.constant 0 : index
    %c0_30 = arith.constant 0 : index
    %93 = vector.load %arg7[%c0_29, %c0_30] : memref<8x128xf32, #tpu.memory_space<vmem>>, vector<8x128xf32>
    tpu.vector_store %arg7[%c0_29, %c0_30], %92 {strides = array<i32>} : memref<8x128xf32, #tpu.memory_space<vmem>>, vector<8x128xf32>,
    %94 = vector.broadcast %8 : f32 to vector<8x128xf32>
    %95 = arith.cmpf ogt, %92, %94 : vector<8x128xf32>
    %cst_31 = arith.constant 1.000000e+00 : f32
    %cst_32 = arith.constant 0.000000e+00 : f32
    %96 = vector.broadcast %cst_31 : f32 to vector<8x128xf32>
    %97 = vector.broadcast %cst_32 : f32 to vector<8x128xf32>
    %98 = arith.select %95, %96, %97 : vector<8x128xi1>, vector<8x128xf32>
    %99 = arith.index_cast %c1_i32 : i32 to index
    %c0_33 = arith.constant 0 : index
    %c0_34 = arith.constant 0 : index
    %100 = vector.load %arg4[%99, %c0_33, %c0_34] : memref<8x8x128xf32, #tpu.memory_space<vmem>>, vector<1x8x128xf32>
    %101 = vector.shape_cast %100 : vector<1x8x128xf32> to vector<8x128xf32>
    %102 = vector.shape_cast %98 : vector<8x128xf32> to vector<1x8x128xf32>
    tpu.vector_store %arg4[%99, %c0_33, %c0_34], %102 {strides = array<i32>} : memref<8x8x128xf32, #tpu.memory_space<vmem>>, vector<1x8x128xf32>,
    %103 = arith.index_cast %c1_i32 : i32 to index
    %c0_35 = arith.constant 0 : index
    %c0_36 = arith.constant 0 : index
    %104 = vector.load %arg5[%103, %c0_35, %c0_36] : memref<8x8x128xf32, #tpu.memory_space<vmem>>, vector<1x8x128xf32>
    %105 = vector.shape_cast %104 : vector<1x8x128xf32> to vector<8x128xf32>
    %106 = vector.shape_cast %92 : vector<8x128xf32> to vector<1x8x128xf32>
    tpu.vector_store %arg5[%103, %c0_35, %c0_36], %106 {strides = array<i32>} : memref<8x8x128xf32, #tpu.memory_space<vmem>>, vector<1x8x128xf32>,
    %c2_i32 = arith.constant 2 : i32
    %107 = arith.index_cast %c2_i32 : i32 to index
    %c0_37 = arith.constant 0 : index
    %c0_38 = arith.constant 0 : index
    %108 = vector.load %arg3[%107, %c0_37, %c0_38] : memref<8x8x128xf32, #tpu.memory_space<vmem>>, vector<1x8x128xf32>
    %109 = vector.shape_cast %108 : vector<1x8x128xf32> to vector<8x128xf32>
    %110 = vector.broadcast %3 : f32 to vector<8x128xf32>
    %111 = arith.mulf %109, %110 : vector<8x128xf32>
    %112 = vector.broadcast %4 : f32 to vector<8x128xf32>
    %113 = arith.addf %111, %112 : vector<8x128xf32>
    %c0_39 = arith.constant 0 : index
    %c0_40 = arith.constant 0 : index
    %114 = vector.load %arg6[%c0_39, %c0_40] : memref<8x128xf32, #tpu.memory_space<vmem>>, vector<8x128xf32>
    %115 = vector.broadcast %7 : f32 to vector<8x128xf32>
    %116 = arith.mulf %115, %114 : vector<8x128xf32>
    %117 = arith.addf %116, %113 : vector<8x128xf32>
    %118 = vector.broadcast %8 : f32 to vector<8x128xf32>
    %119 = arith.cmpf ogt, %114, %118 : vector<8x128xf32>
    %120 = vector.broadcast %8 : f32 to vector<8x128xf32>
    %121 = arith.subf %117, %120 : vector<8x128xf32>
    %122 = arith.select %119, %121, %117 : vector<8x128xi1>, vector<8x128xf32>
    %c0_41 = arith.constant 0 : index
    %c0_42 = arith.constant 0 : index
    %123 = vector.load %arg6[%c0_41, %c0_42] : memref<8x128xf32, #tpu.memory_space<vmem>>, vector<8x128xf32>
    tpu.vector_store %arg6[%c0_41, %c0_42], %122 {strides = array<i32>} : memref<8x128xf32, #tpu.memory_space<vmem>>, vector<8x128xf32>,
    %124 = vector.broadcast %8 : f32 to vector<8x128xf32>
    %125 = arith.cmpf ogt, %122, %124 : vector<8x128xf32>
    %cst_43 = arith.constant 1.000000e+00 : f32
    %cst_44 = arith.constant 0.000000e+00 : f32
    %126 = vector.broadcast %cst_43 : f32 to vector<8x128xf32>
    %127 = vector.broadcast %cst_44 : f32 to vector<8x128xf32>
    %128 = arith.select %125, %126, %127 : vector<8x128xi1>, vector<8x128xf32>
    %129 = vector.broadcast %5 : f32 to vector<8x128xf32>
    %130 = arith.mulf %128, %129 : vector<8x128xf32>
    %131 = vector.broadcast %6 : f32 to vector<8x128xf32>
    %132 = arith.addf %130, %131 : vector<8x128xf32>
    %c0_45 = arith.constant 0 : index
    %c0_46 = arith.constant 0 : index
    %133 = vector.load %arg7[%c0_45, %c0_46] : memref<8x128xf32, #tpu.memory_space<vmem>>, vector<8x128xf32>
    %134 = vector.broadcast %7 : f32 to vector<8x128xf32>
    %135 = arith.mulf %134, %133 : vector<8x128xf32>
    %136 = arith.addf %135, %132 : vector<8x128xf32>
    %137 = vector.broadcast %8 : f32 to vector<8x128xf32>
    %138 = arith.cmpf ogt, %133, %137 : vector<8x128xf32>
    %139 = vector.broadcast %8 : f32 to vector<8x128xf32>
    %140 = arith.subf %136, %139 : vector<8x128xf32>
    %141 = arith.select %138, %140, %136 : vector<8x128xi1>, vector<8x128xf32>
    %c0_47 = arith.constant 0 : index
    %c0_48 = arith.constant 0 : index
    %142 = vector.load %arg7[%c0_47, %c0_48] : memref<8x128xf32, #tpu.memory_space<vmem>>, vector<8x128xf32>
    tpu.vector_store %arg7[%c0_47, %c0_48], %141 {strides = array<i32>} : memref<8x128xf32, #tpu.memory_space<vmem>>, vector<8x128xf32>,
    %143 = vector.broadcast %8 : f32 to vector<8x128xf32>
    %144 = arith.cmpf ogt, %141, %143 : vector<8x128xf32>
    %cst_49 = arith.constant 1.000000e+00 : f32
    %cst_50 = arith.constant 0.000000e+00 : f32
    %145 = vector.broadcast %cst_49 : f32 to vector<8x128xf32>
    %146 = vector.broadcast %cst_50 : f32 to vector<8x128xf32>
    %147 = arith.select %144, %145, %146 : vector<8x128xi1>, vector<8x128xf32>
    %148 = arith.index_cast %c2_i32 : i32 to index
    %c0_51 = arith.constant 0 : index
    %c0_52 = arith.constant 0 : index
    %149 = vector.load %arg4[%148, %c0_51, %c0_52] : memref<8x8x128xf32, #tpu.memory_space<vmem>>, vector<1x8x128xf32>
    %150 = vector.shape_cast %149 : vector<1x8x128xf32> to vector<8x128xf32>
    %151 = vector.shape_cast %147 : vector<8x128xf32> to vector<1x8x128xf32>
    tpu.vector_store %arg4[%148, %c0_51, %c0_52], %151 {strides = array<i32>} : memref<8x8x128xf32, #tpu.memory_space<vmem>>, vector<1x8x128xf32>,
    %152 = arith.index_cast %c2_i32 : i32 to index
    %c0_53 = arith.constant 0 : index
    %c0_54 = arith.constant 0 : index
    %153 = vector.load %arg5[%152, %c0_53, %c0_54] : memref<8x8x128xf32, #tpu.memory_space<vmem>>, vector<1x8x128xf32>
    %154 = vector.shape_cast %153 : vector<1x8x128xf32> to vector<8x128xf32>
    %155 = vector.shape_cast %141 : vector<8x128xf32> to vector<1x8x128xf32>
    tpu.vector_store %arg5[%152, %c0_53, %c0_54], %155 {strides = array<i32>} : memref<8x8x128xf32, #tpu.memory_space<vmem>>, vector<1x8x128xf32>,
    %c3_i32 = arith.constant 3 : i32
    %156 = arith.index_cast %c3_i32 : i32 to index
    %c0_55 = arith.constant 0 : index
    %c0_56 = arith.constant 0 : index
    %157 = vector.load %arg3[%156, %c0_55, %c0_56] : memref<8x8x128xf32, #tpu.memory_space<vmem>>, vector<1x8x128xf32>
    %158 = vector.shape_cast %157 : vector<1x8x128xf32> to vector<8x128xf32>
    %159 = vector.broadcast %3 : f32 to vector<8x128xf32>
    %160 = arith.mulf %158, %159 : vector<8x128xf32>
    %161 = vector.broadcast %4 : f32 to vector<8x128xf32>
    %162 = arith.addf %160, %161 : vector<8x128xf32>
    %c0_57 = arith.constant 0 : index
    %c0_58 = arith.constant 0 : index
    %163 = vector.load %arg6[%c0_57, %c0_58] : memref<8x128xf32, #tpu.memory_space<vmem>>, vector<8x128xf32>
    %164 = vector.broadcast %7 : f32 to vector<8x128xf32>
    %165 = arith.mulf %164, %163 : vector<8x128xf32>
    %166 = arith.addf %165, %162 : vector<8x128xf32>
    %167 = vector.broadcast %8 : f32 to vector<8x128xf32>
    %168 = arith.cmpf ogt, %163, %167 : vector<8x128xf32>
    %169 = vector.broadcast %8 : f32 to vector<8x128xf32>
    %170 = arith.subf %166, %169 : vector<8x128xf32>
    %171 = arith.select %168, %170, %166 : vector<8x128xi1>, vector<8x128xf32>
    %c0_59 = arith.constant 0 : index
    %c0_60 = arith.constant 0 : index
    %172 = vector.load %arg6[%c0_59, %c0_60] : memref<8x128xf32, #tpu.memory_space<vmem>>, vector<8x128xf32>
    tpu.vector_store %arg6[%c0_59, %c0_60], %171 {strides = array<i32>} : memref<8x128xf32, #tpu.memory_space<vmem>>, vector<8x128xf32>,
    %173 = vector.broadcast %8 : f32 to vector<8x128xf32>
    %174 = arith.cmpf ogt, %171, %173 : vector<8x128xf32>
    %cst_61 = arith.constant 1.000000e+00 : f32
    %cst_62 = arith.constant 0.000000e+00 : f32
    %175 = vector.broadcast %cst_61 : f32 to vector<8x128xf32>
    %176 = vector.broadcast %cst_62 : f32 to vector<8x128xf32>
    %177 = arith.select %174, %175, %176 : vector<8x128xi1>, vector<8x128xf32>
    %178 = vector.broadcast %5 : f32 to vector<8x128xf32>
    %179 = arith.mulf %177, %178 : vector<8x128xf32>
    %180 = vector.broadcast %6 : f32 to vector<8x128xf32>
    %181 = arith.addf %179, %180 : vector<8x128xf32>
    %c0_63 = arith.constant 0 : index
    %c0_64 = arith.constant 0 : index
    %182 = vector.load %arg7[%c0_63, %c0_64] : memref<8x128xf32, #tpu.memory_space<vmem>>, vector<8x128xf32>
    %183 = vector.broadcast %7 : f32 to vector<8x128xf32>
    %184 = arith.mulf %183, %182 : vector<8x128xf32>
    %185 = arith.addf %184, %181 : vector<8x128xf32>
    %186 = vector.broadcast %8 : f32 to vector<8x128xf32>
    %187 = arith.cmpf ogt, %182, %186 : vector<8x128xf32>
    %188 = vector.broadcast %8 : f32 to vector<8x128xf32>
    %189 = arith.subf %185, %188 : vector<8x128xf32>
    %190 = arith.select %187, %189, %185 : vector<8x128xi1>, vector<8x128xf32>
    %c0_65 = arith.constant 0 : index
    %c0_66 = arith.constant 0 : index
    %191 = vector.load %arg7[%c0_65, %c0_66] : memref<8x128xf32, #tpu.memory_space<vmem>>, vector<8x128xf32>
    tpu.vector_store %arg7[%c0_65, %c0_66], %190 {strides = array<i32>} : memref<8x128xf32, #tpu.memory_space<vmem>>, vector<8x128xf32>,
    %192 = vector.broadcast %8 : f32 to vector<8x128xf32>
    %193 = arith.cmpf ogt, %190, %192 : vector<8x128xf32>
    %cst_67 = arith.constant 1.000000e+00 : f32
    %cst_68 = arith.constant 0.000000e+00 : f32
    %194 = vector.broadcast %cst_67 : f32 to vector<8x128xf32>
    %195 = vector.broadcast %cst_68 : f32 to vector<8x128xf32>
    %196 = arith.select %193, %194, %195 : vector<8x128xi1>, vector<8x128xf32>
    %197 = arith.index_cast %c3_i32 : i32 to index
    %c0_69 = arith.constant 0 : index
    %c0_70 = arith.constant 0 : index
    %198 = vector.load %arg4[%197, %c0_69, %c0_70] : memref<8x8x128xf32, #tpu.memory_space<vmem>>, vector<1x8x128xf32>
    %199 = vector.shape_cast %198 : vector<1x8x128xf32> to vector<8x128xf32>
    %200 = vector.shape_cast %196 : vector<8x128xf32> to vector<1x8x128xf32>
    tpu.vector_store %arg4[%197, %c0_69, %c0_70], %200 {strides = array<i32>} : memref<8x8x128xf32, #tpu.memory_space<vmem>>, vector<1x8x128xf32>,
    %201 = arith.index_cast %c3_i32 : i32 to index
    %c0_71 = arith.constant 0 : index
    %c0_72 = arith.constant 0 : index
    %202 = vector.load %arg5[%201, %c0_71, %c0_72] : memref<8x8x128xf32, #tpu.memory_space<vmem>>, vector<1x8x128xf32>
    %203 = vector.shape_cast %202 : vector<1x8x128xf32> to vector<8x128xf32>
    %204 = vector.shape_cast %190 : vector<8x128xf32> to vector<1x8x128xf32>
    tpu.vector_store %arg5[%201, %c0_71, %c0_72], %204 {strides = array<i32>} : memref<8x8x128xf32, #tpu.memory_space<vmem>>, vector<1x8x128xf32>,
    %c4_i32 = arith.constant 4 : i32
    %205 = arith.index_cast %c4_i32 : i32 to index
    %c0_73 = arith.constant 0 : index
    %c0_74 = arith.constant 0 : index
    %206 = vector.load %arg3[%205, %c0_73, %c0_74] : memref<8x8x128xf32, #tpu.memory_space<vmem>>, vector<1x8x128xf32>
    %207 = vector.shape_cast %206 : vector<1x8x128xf32> to vector<8x128xf32>
    %208 = vector.broadcast %3 : f32 to vector<8x128xf32>
    %209 = arith.mulf %207, %208 : vector<8x128xf32>
    %210 = vector.broadcast %4 : f32 to vector<8x128xf32>
    %211 = arith.addf %209, %210 : vector<8x128xf32>
    %c0_75 = arith.constant 0 : index
    %c0_76 = arith.constant 0 : index
    %212 = vector.load %arg6[%c0_75, %c0_76] : memref<8x128xf32, #tpu.memory_space<vmem>>, vector<8x128xf32>
    %213 = vector.broadcast %7 : f32 to vector<8x128xf32>
    %214 = arith.mulf %213, %212 : vector<8x128xf32>
    %215 = arith.addf %214, %211 : vector<8x128xf32>
    %216 = vector.broadcast %8 : f32 to vector<8x128xf32>
    %217 = arith.cmpf ogt, %212, %216 : vector<8x128xf32>
    %218 = vector.broadcast %8 : f32 to vector<8x128xf32>
    %219 = arith.subf %215, %218 : vector<8x128xf32>
    %220 = arith.select %217, %219, %215 : vector<8x128xi1>, vector<8x128xf32>
    %c0_77 = arith.constant 0 : index
    %c0_78 = arith.constant 0 : index
    %221 = vector.load %arg6[%c0_77, %c0_78] : memref<8x128xf32, #tpu.memory_space<vmem>>, vector<8x128xf32>
    tpu.vector_store %arg6[%c0_77, %c0_78], %220 {strides = array<i32>} : memref<8x128xf32, #tpu.memory_space<vmem>>, vector<8x128xf32>,
    %222 = vector.broadcast %8 : f32 to vector<8x128xf32>
    %223 = arith.cmpf ogt, %220, %222 : vector<8x128xf32>
    %cst_79 = arith.constant 1.000000e+00 : f32
    %cst_80 = arith.constant 0.000000e+00 : f32
    %224 = vector.broadcast %cst_79 : f32 to vector<8x128xf32>
    %225 = vector.broadcast %cst_80 : f32 to vector<8x128xf32>
    %226 = arith.select %223, %224, %225 : vector<8x128xi1>, vector<8x128xf32>
    %227 = vector.broadcast %5 : f32 to vector<8x128xf32>
    %228 = arith.mulf %226, %227 : vector<8x128xf32>
    %229 = vector.broadcast %6 : f32 to vector<8x128xf32>
    %230 = arith.addf %228, %229 : vector<8x128xf32>
    %c0_81 = arith.constant 0 : index
    %c0_82 = arith.constant 0 : index
    %231 = vector.load %arg7[%c0_81, %c0_82] : memref<8x128xf32, #tpu.memory_space<vmem>>, vector<8x128xf32>
    %232 = vector.broadcast %7 : f32 to vector<8x128xf32>
    %233 = arith.mulf %232, %231 : vector<8x128xf32>
    %234 = arith.addf %233, %230 : vector<8x128xf32>
    %235 = vector.broadcast %8 : f32 to vector<8x128xf32>
    %236 = arith.cmpf ogt, %231, %235 : vector<8x128xf32>
    %237 = vector.broadcast %8 : f32 to vector<8x128xf32>
    %238 = arith.subf %234, %237 : vector<8x128xf32>
    %239 = arith.select %236, %238, %234 : vector<8x128xi1>, vector<8x128xf32>
    %c0_83 = arith.constant 0 : index
    %c0_84 = arith.constant 0 : index
    %240 = vector.load %arg7[%c0_83, %c0_84] : memref<8x128xf32, #tpu.memory_space<vmem>>, vector<8x128xf32>
    tpu.vector_store %arg7[%c0_83, %c0_84], %239 {strides = array<i32>} : memref<8x128xf32, #tpu.memory_space<vmem>>, vector<8x128xf32>,
    %241 = vector.broadcast %8 : f32 to vector<8x128xf32>
    %242 = arith.cmpf ogt, %239, %241 : vector<8x128xf32>
    %cst_85 = arith.constant 1.000000e+00 : f32
    %cst_86 = arith.constant 0.000000e+00 : f32
    %243 = vector.broadcast %cst_85 : f32 to vector<8x128xf32>
    %244 = vector.broadcast %cst_86 : f32 to vector<8x128xf32>
    %245 = arith.select %242, %243, %244 : vector<8x128xi1>, vector<8x128xf32>
    %246 = arith.index_cast %c4_i32 : i32 to index
    %c0_87 = arith.constant 0 : index
    %c0_88 = arith.constant 0 : index
    %247 = vector.load %arg4[%246, %c0_87, %c0_88] : memref<8x8x128xf32, #tpu.memory_space<vmem>>, vector<1x8x128xf32>
    %248 = vector.shape_cast %247 : vector<1x8x128xf32> to vector<8x128xf32>
    %249 = vector.shape_cast %245 : vector<8x128xf32> to vector<1x8x128xf32>
    tpu.vector_store %arg4[%246, %c0_87, %c0_88], %249 {strides = array<i32>} : memref<8x8x128xf32, #tpu.memory_space<vmem>>, vector<1x8x128xf32>,
    %250 = arith.index_cast %c4_i32 : i32 to index
    %c0_89 = arith.constant 0 : index
    %c0_90 = arith.constant 0 : index
    %251 = vector.load %arg5[%250, %c0_89, %c0_90] : memref<8x8x128xf32, #tpu.memory_space<vmem>>, vector<1x8x128xf32>
    %252 = vector.shape_cast %251 : vector<1x8x128xf32> to vector<8x128xf32>
    %253 = vector.shape_cast %239 : vector<8x128xf32> to vector<1x8x128xf32>
    tpu.vector_store %arg5[%250, %c0_89, %c0_90], %253 {strides = array<i32>} : memref<8x8x128xf32, #tpu.memory_space<vmem>>, vector<1x8x128xf32>,
    %c5_i32 = arith.constant 5 : i32
    %254 = arith.index_cast %c5_i32 : i32 to index
    %c0_91 = arith.constant 0 : index
    %c0_92 = arith.constant 0 : index
    %255 = vector.load %arg3[%254, %c0_91, %c0_92] : memref<8x8x128xf32, #tpu.memory_space<vmem>>, vector<1x8x128xf32>
    %256 = vector.shape_cast %255 : vector<1x8x128xf32> to vector<8x128xf32>
    %257 = vector.broadcast %3 : f32 to vector<8x128xf32>
    %258 = arith.mulf %256, %257 : vector<8x128xf32>
    %259 = vector.broadcast %4 : f32 to vector<8x128xf32>
    %260 = arith.addf %258, %259 : vector<8x128xf32>
    %c0_93 = arith.constant 0 : index
    %c0_94 = arith.constant 0 : index
    %261 = vector.load %arg6[%c0_93, %c0_94] : memref<8x128xf32, #tpu.memory_space<vmem>>, vector<8x128xf32>
    %262 = vector.broadcast %7 : f32 to vector<8x128xf32>
    %263 = arith.mulf %262, %261 : vector<8x128xf32>
    %264 = arith.addf %263, %260 : vector<8x128xf32>
    %265 = vector.broadcast %8 : f32 to vector<8x128xf32>
    %266 = arith.cmpf ogt, %261, %265 : vector<8x128xf32>
    %267 = vector.broadcast %8 : f32 to vector<8x128xf32>
    %268 = arith.subf %264, %267 : vector<8x128xf32>
    %269 = arith.select %266, %268, %264 : vector<8x128xi1>, vector<8x128xf32>
    %c0_95 = arith.constant 0 : index
    %c0_96 = arith.constant 0 : index
    %270 = vector.load %arg6[%c0_95, %c0_96] : memref<8x128xf32, #tpu.memory_space<vmem>>, vector<8x128xf32>
    tpu.vector_store %arg6[%c0_95, %c0_96], %269 {strides = array<i32>} : memref<8x128xf32, #tpu.memory_space<vmem>>, vector<8x128xf32>,
    %271 = vector.broadcast %8 : f32 to vector<8x128xf32>
    %272 = arith.cmpf ogt, %269, %271 : vector<8x128xf32>
    %cst_97 = arith.constant 1.000000e+00 : f32
    %cst_98 = arith.constant 0.000000e+00 : f32
    %273 = vector.broadcast %cst_97 : f32 to vector<8x128xf32>
    %274 = vector.broadcast %cst_98 : f32 to vector<8x128xf32>
    %275 = arith.select %272, %273, %274 : vector<8x128xi1>, vector<8x128xf32>
    %276 = vector.broadcast %5 : f32 to vector<8x128xf32>
    %277 = arith.mulf %275, %276 : vector<8x128xf32>
    %278 = vector.broadcast %6 : f32 to vector<8x128xf32>
    %279 = arith.addf %277, %278 : vector<8x128xf32>
    %c0_99 = arith.constant 0 : index
    %c0_100 = arith.constant 0 : index
    %280 = vector.load %arg7[%c0_99, %c0_100] : memref<8x128xf32, #tpu.memory_space<vmem>>, vector<8x128xf32>
    %281 = vector.broadcast %7 : f32 to vector<8x128xf32>
    %282 = arith.mulf %281, %280 : vector<8x128xf32>
    %283 = arith.addf %282, %279 : vector<8x128xf32>
    %284 = vector.broadcast %8 : f32 to vector<8x128xf32>
    %285 = arith.cmpf ogt, %280, %284 : vector<8x128xf32>
    %286 = vector.broadcast %8 : f32 to vector<8x128xf32>
    %287 = arith.subf %283, %286 : vector<8x128xf32>
    %288 = arith.select %285, %287, %283 : vector<8x128xi1>, vector<8x128xf32>
    %c0_101 = arith.constant 0 : index
    %c0_102 = arith.constant 0 : index
    %289 = vector.load %arg7[%c0_101, %c0_102] : memref<8x128xf32, #tpu.memory_space<vmem>>, vector<8x128xf32>
    tpu.vector_store %arg7[%c0_101, %c0_102], %288 {strides = array<i32>} : memref<8x128xf32, #tpu.memory_space<vmem>>, vector<8x128xf32>,
    %290 = vector.broadcast %8 : f32 to vector<8x128xf32>
    %291 = arith.cmpf ogt, %288, %290 : vector<8x128xf32>
    %cst_103 = arith.constant 1.000000e+00 : f32
    %cst_104 = arith.constant 0.000000e+00 : f32
    %292 = vector.broadcast %cst_103 : f32 to vector<8x128xf32>
    %293 = vector.broadcast %cst_104 : f32 to vector<8x128xf32>
    %294 = arith.select %291, %292, %293 : vector<8x128xi1>, vector<8x128xf32>
    %295 = arith.index_cast %c5_i32 : i32 to index
    %c0_105 = arith.constant 0 : index
    %c0_106 = arith.constant 0 : index
    %296 = vector.load %arg4[%295, %c0_105, %c0_106] : memref<8x8x128xf32, #tpu.memory_space<vmem>>, vector<1x8x128xf32>
    %297 = vector.shape_cast %296 : vector<1x8x128xf32> to vector<8x128xf32>
    %298 = vector.shape_cast %294 : vector<8x128xf32> to vector<1x8x128xf32>
    tpu.vector_store %arg4[%295, %c0_105, %c0_106], %298 {strides = array<i32>} : memref<8x8x128xf32, #tpu.memory_space<vmem>>, vector<1x8x128xf32>,
    %299 = arith.index_cast %c5_i32 : i32 to index
    %c0_107 = arith.constant 0 : index
    %c0_108 = arith.constant 0 : index
    %300 = vector.load %arg5[%299, %c0_107, %c0_108] : memref<8x8x128xf32, #tpu.memory_space<vmem>>, vector<1x8x128xf32>
    %301 = vector.shape_cast %300 : vector<1x8x128xf32> to vector<8x128xf32>
    %302 = vector.shape_cast %288 : vector<8x128xf32> to vector<1x8x128xf32>
    tpu.vector_store %arg5[%299, %c0_107, %c0_108], %302 {strides = array<i32>} : memref<8x8x128xf32, #tpu.memory_space<vmem>>, vector<1x8x128xf32>,
    %c6_i32 = arith.constant 6 : i32
    %303 = arith.index_cast %c6_i32 : i32 to index
    %c0_109 = arith.constant 0 : index
    %c0_110 = arith.constant 0 : index
    %304 = vector.load %arg3[%303, %c0_109, %c0_110] : memref<8x8x128xf32, #tpu.memory_space<vmem>>, vector<1x8x128xf32>
    %305 = vector.shape_cast %304 : vector<1x8x128xf32> to vector<8x128xf32>
    %306 = vector.broadcast %3 : f32 to vector<8x128xf32>
    %307 = arith.mulf %305, %306 : vector<8x128xf32>
    %308 = vector.broadcast %4 : f32 to vector<8x128xf32>
    %309 = arith.addf %307, %308 : vector<8x128xf32>
    %c0_111 = arith.constant 0 : index
    %c0_112 = arith.constant 0 : index
    %310 = vector.load %arg6[%c0_111, %c0_112] : memref<8x128xf32, #tpu.memory_space<vmem>>, vector<8x128xf32>
    %311 = vector.broadcast %7 : f32 to vector<8x128xf32>
    %312 = arith.mulf %311, %310 : vector<8x128xf32>
    %313 = arith.addf %312, %309 : vector<8x128xf32>
    %314 = vector.broadcast %8 : f32 to vector<8x128xf32>
    %315 = arith.cmpf ogt, %310, %314 : vector<8x128xf32>
    %316 = vector.broadcast %8 : f32 to vector<8x128xf32>
    %317 = arith.subf %313, %316 : vector<8x128xf32>
    %318 = arith.select %315, %317, %313 : vector<8x128xi1>, vector<8x128xf32>
    %c0_113 = arith.constant 0 : index
    %c0_114 = arith.constant 0 : index
    %319 = vector.load %arg6[%c0_113, %c0_114] : memref<8x128xf32, #tpu.memory_space<vmem>>, vector<8x128xf32>
    tpu.vector_store %arg6[%c0_113, %c0_114], %318 {strides = array<i32>} : memref<8x128xf32, #tpu.memory_space<vmem>>, vector<8x128xf32>,
    %320 = vector.broadcast %8 : f32 to vector<8x128xf32>
    %321 = arith.cmpf ogt, %318, %320 : vector<8x128xf32>
    %cst_115 = arith.constant 1.000000e+00 : f32
    %cst_116 = arith.constant 0.000000e+00 : f32
    %322 = vector.broadcast %cst_115 : f32 to vector<8x128xf32>
    %323 = vector.broadcast %cst_116 : f32 to vector<8x128xf32>
    %324 = arith.select %321, %322, %323 : vector<8x128xi1>, vector<8x128xf32>
    %325 = vector.broadcast %5 : f32 to vector<8x128xf32>
    %326 = arith.mulf %324, %325 : vector<8x128xf32>
    %327 = vector.broadcast %6 : f32 to vector<8x128xf32>
    %328 = arith.addf %326, %327 : vector<8x128xf32>
    %c0_117 = arith.constant 0 : index
    %c0_118 = arith.constant 0 : index
    %329 = vector.load %arg7[%c0_117, %c0_118] : memref<8x128xf32, #tpu.memory_space<vmem>>, vector<8x128xf32>
    %330 = vector.broadcast %7 : f32 to vector<8x128xf32>
    %331 = arith.mulf %330, %329 : vector<8x128xf32>
    %332 = arith.addf %331, %328 : vector<8x128xf32>
    %333 = vector.broadcast %8 : f32 to vector<8x128xf32>
    %334 = arith.cmpf ogt, %329, %333 : vector<8x128xf32>
    %335 = vector.broadcast %8 : f32 to vector<8x128xf32>
    %336 = arith.subf %332, %335 : vector<8x128xf32>
    %337 = arith.select %334, %336, %332 : vector<8x128xi1>, vector<8x128xf32>
    %c0_119 = arith.constant 0 : index
    %c0_120 = arith.constant 0 : index
    %338 = vector.load %arg7[%c0_119, %c0_120] : memref<8x128xf32, #tpu.memory_space<vmem>>, vector<8x128xf32>
    tpu.vector_store %arg7[%c0_119, %c0_120], %337 {strides = array<i32>} : memref<8x128xf32, #tpu.memory_space<vmem>>, vector<8x128xf32>,
    %339 = vector.broadcast %8 : f32 to vector<8x128xf32>
    %340 = arith.cmpf ogt, %337, %339 : vector<8x128xf32>
    %cst_121 = arith.constant 1.000000e+00 : f32
    %cst_122 = arith.constant 0.000000e+00 : f32
    %341 = vector.broadcast %cst_121 : f32 to vector<8x128xf32>
    %342 = vector.broadcast %cst_122 : f32 to vector<8x128xf32>
    %343 = arith.select %340, %341, %342 : vector<8x128xi1>, vector<8x128xf32>
    %344 = arith.index_cast %c6_i32 : i32 to index
    %c0_123 = arith.constant 0 : index
    %c0_124 = arith.constant 0 : index
    %345 = vector.load %arg4[%344, %c0_123, %c0_124] : memref<8x8x128xf32, #tpu.memory_space<vmem>>, vector<1x8x128xf32>
    %346 = vector.shape_cast %345 : vector<1x8x128xf32> to vector<8x128xf32>
    %347 = vector.shape_cast %343 : vector<8x128xf32> to vector<1x8x128xf32>
    tpu.vector_store %arg4[%344, %c0_123, %c0_124], %347 {strides = array<i32>} : memref<8x8x128xf32, #tpu.memory_space<vmem>>, vector<1x8x128xf32>,
    %348 = arith.index_cast %c6_i32 : i32 to index
    %c0_125 = arith.constant 0 : index
    %c0_126 = arith.constant 0 : index
    %349 = vector.load %arg5[%348, %c0_125, %c0_126] : memref<8x8x128xf32, #tpu.memory_space<vmem>>, vector<1x8x128xf32>
    %350 = vector.shape_cast %349 : vector<1x8x128xf32> to vector<8x128xf32>
    %351 = vector.shape_cast %337 : vector<8x128xf32> to vector<1x8x128xf32>
    tpu.vector_store %arg5[%348, %c0_125, %c0_126], %351 {strides = array<i32>} : memref<8x8x128xf32, #tpu.memory_space<vmem>>, vector<1x8x128xf32>,
    %c7_i32 = arith.constant 7 : i32
    %352 = arith.index_cast %c7_i32 : i32 to index
    %c0_127 = arith.constant 0 : index
    %c0_128 = arith.constant 0 : index
    %353 = vector.load %arg3[%352, %c0_127, %c0_128] : memref<8x8x128xf32, #tpu.memory_space<vmem>>, vector<1x8x128xf32>
    %354 = vector.shape_cast %353 : vector<1x8x128xf32> to vector<8x128xf32>
    %355 = vector.broadcast %3 : f32 to vector<8x128xf32>
    %356 = arith.mulf %354, %355 : vector<8x128xf32>
    %357 = vector.broadcast %4 : f32 to vector<8x128xf32>
    %358 = arith.addf %356, %357 : vector<8x128xf32>
    %c0_129 = arith.constant 0 : index
    %c0_130 = arith.constant 0 : index
    %359 = vector.load %arg6[%c0_129, %c0_130] : memref<8x128xf32, #tpu.memory_space<vmem>>, vector<8x128xf32>
    %360 = vector.broadcast %7 : f32 to vector<8x128xf32>
    %361 = arith.mulf %360, %359 : vector<8x128xf32>
    %362 = arith.addf %361, %358 : vector<8x128xf32>
    %363 = vector.broadcast %8 : f32 to vector<8x128xf32>
    %364 = arith.cmpf ogt, %359, %363 : vector<8x128xf32>
    %365 = vector.broadcast %8 : f32 to vector<8x128xf32>
    %366 = arith.subf %362, %365 : vector<8x128xf32>
    %367 = arith.select %364, %366, %362 : vector<8x128xi1>, vector<8x128xf32>
    %c0_131 = arith.constant 0 : index
    %c0_132 = arith.constant 0 : index
    %368 = vector.load %arg6[%c0_131, %c0_132] : memref<8x128xf32, #tpu.memory_space<vmem>>, vector<8x128xf32>
    tpu.vector_store %arg6[%c0_131, %c0_132], %367 {strides = array<i32>} : memref<8x128xf32, #tpu.memory_space<vmem>>, vector<8x128xf32>,
    %369 = vector.broadcast %8 : f32 to vector<8x128xf32>
    %370 = arith.cmpf ogt, %367, %369 : vector<8x128xf32>
    %cst_133 = arith.constant 1.000000e+00 : f32
    %cst_134 = arith.constant 0.000000e+00 : f32
    %371 = vector.broadcast %cst_133 : f32 to vector<8x128xf32>
    %372 = vector.broadcast %cst_134 : f32 to vector<8x128xf32>
    %373 = arith.select %370, %371, %372 : vector<8x128xi1>, vector<8x128xf32>
    %374 = vector.broadcast %5 : f32 to vector<8x128xf32>
    %375 = arith.mulf %373, %374 : vector<8x128xf32>
    %376 = vector.broadcast %6 : f32 to vector<8x128xf32>
    %377 = arith.addf %375, %376 : vector<8x128xf32>
    %c0_135 = arith.constant 0 : index
    %c0_136 = arith.constant 0 : index
    %378 = vector.load %arg7[%c0_135, %c0_136] : memref<8x128xf32, #tpu.memory_space<vmem>>, vector<8x128xf32>
    %379 = vector.broadcast %7 : f32 to vector<8x128xf32>
    %380 = arith.mulf %379, %378 : vector<8x128xf32>
    %381 = arith.addf %380, %377 : vector<8x128xf32>
    %382 = vector.broadcast %8 : f32 to vector<8x128xf32>
    %383 = arith.cmpf ogt, %378, %382 : vector<8x128xf32>
    %384 = vector.broadcast %8 : f32 to vector<8x128xf32>
    %385 = arith.subf %381, %384 : vector<8x128xf32>
    %386 = arith.select %383, %385, %381 : vector<8x128xi1>, vector<8x128xf32>
    %c0_137 = arith.constant 0 : index
    %c0_138 = arith.constant 0 : index
    %387 = vector.load %arg7[%c0_137, %c0_138] : memref<8x128xf32, #tpu.memory_space<vmem>>, vector<8x128xf32>
    tpu.vector_store %arg7[%c0_137, %c0_138], %386 {strides = array<i32>} : memref<8x128xf32, #tpu.memory_space<vmem>>, vector<8x128xf32>,
    %388 = vector.broadcast %8 : f32 to vector<8x128xf32>
    %389 = arith.cmpf ogt, %386, %388 : vector<8x128xf32>
    %cst_139 = arith.constant 1.000000e+00 : f32
    %cst_140 = arith.constant 0.000000e+00 : f32
    %390 = vector.broadcast %cst_139 : f32 to vector<8x128xf32>
    %391 = vector.broadcast %cst_140 : f32 to vector<8x128xf32>
    %392 = arith.select %389, %390, %391 : vector<8x128xi1>, vector<8x128xf32>
    %393 = arith.index_cast %c7_i32 : i32 to index
    %c0_141 = arith.constant 0 : index
    %c0_142 = arith.constant 0 : index
    %394 = vector.load %arg4[%393, %c0_141, %c0_142] : memref<8x8x128xf32, #tpu.memory_space<vmem>>, vector<1x8x128xf32>
    %395 = vector.shape_cast %394 : vector<1x8x128xf32> to vector<8x128xf32>
    %396 = vector.shape_cast %392 : vector<8x128xf32> to vector<1x8x128xf32>
    tpu.vector_store %arg4[%393, %c0_141, %c0_142], %396 {strides = array<i32>} : memref<8x8x128xf32, #tpu.memory_space<vmem>>, vector<1x8x128xf32>,
    %397 = arith.index_cast %c7_i32 : i32 to index
    %c0_143 = arith.constant 0 : index
    %c0_144 = arith.constant 0 : index
    %398 = vector.load %arg5[%397, %c0_143, %c0_144] : memref<8x8x128xf32, #tpu.memory_space<vmem>>, vector<1x8x128xf32>
    %399 = vector.shape_cast %398 : vector<1x8x128xf32> to vector<8x128xf32>
    %400 = vector.shape_cast %386 : vector<8x128xf32> to vector<1x8x128xf32>
    tpu.vector_store %arg5[%397, %c0_143, %c0_144], %400 {strides = array<i32>} : memref<8x8x128xf32, #tpu.memory_space<vmem>>, vector<1x8x128xf32>,
    %c8_i32 = arith.constant 8 : i32
    return
  }
  func.func @transform_0(%arg0: i32, %arg1: i32, %arg2: memref<6xf32, #tpu.memory_space<smem>>) -> (i32, i32, i32) {
    %c0_i32 = arith.constant 0 : i32
    %c0_i32_0 = arith.constant 0 : i32
    return %arg1, %arg0, %c0_i32 : i32, i32, i32
  }
  func.func @transform_1(%arg0: i32, %arg1: i32, %arg2: memref<6xf32, #tpu.memory_space<smem>>) -> (i32, i32, i32) {
    %c0_i32 = arith.constant 0 : i32
    %c0_i32_0 = arith.constant 0 : i32
    return %arg1, %arg0, %c0_i32 : i32, i32, i32
  }
  func.func @transform_2(%arg0: i32, %arg1: i32, %arg2: memref<6xf32, #tpu.memory_space<smem>>) -> (i32, i32, i32) {
    %c0_i32 = arith.constant 0 : i32
    %c0_i32_0 = arith.constant 0 : i32
    return %arg1, %arg0, %c0_i32 : i32, i32, i32
  }
}

</mosaic_0001>

<bundles_post_ra>
// kernel: tpu_custom_call.1
= control target key start
LH: loop header
LB: loop body
LE: loop exit
PB: predicated region body
PF: predicated region fallthrough
CT: control target
= control target key end

     0   :  { %s418_s15 = smov [#allocation5]   ;;  %s622_s0 = inlined_call_operand.hbm [shape: f32[6], index: 0, kind: input, shape index: {}]   ;;  %s623_s1 = inlined_call_operand.hbm [shape: f32[8,8,128], index: 1, kind: input, shape index: {}]   ;;  %s624_s2 = inlined_call_operand.hbm [shape: f32[8,8,128], index: 2, kind: output, shape index: {0}]   ;;  %s625_s3 = inlined_call_operand.hbm [shape: f32[8,8,128], index: 3, kind: output, shape index: {1}]  }
   0x1   :  { %s10_s14 = sshll.u32 %s622_s0, 4  ;;  %s11_s14 = int_to_ptr.hbm [resolvable:$true] %s10_s14 }
   0x2   :  { %13 = dma.hbm_to_smem %s11_s14, 16, %s418_s15, [#allocation4] }
   0x3   :  { %410 = dma.done.wait [#allocation4], 16 }
   0x4   :  { %411 = vsyncadd [#allocation4], 4294967280 }
   0x5   :  { %16 = sfence }
   0x6   :  { %17 = vsyncpa [#allocation7], 0 }
   0x7   :  { %18 = vsyncpa [#allocation8], 0 }
   0x8   :  { %19 = vsyncpa [#allocation11], 0  ;;  %s24_s18 = sshll.u32 %s623_s1, 4  ;;  %s419_s19 = smov [#allocation6]   ;;  %s25_s18 = int_to_ptr.hbm [resolvable:$true] %s24_s18 }
   0x9   :  { %s26_s20 = sshll.u32 %s419_s19, 4  ;;  %s420_s21 = smov 128   ;;  %s27_s20 = int_to_ptr.vmem [resolvable:$true] %s26_s20 }
   0xa   :  { %s421_s22 = smov 8  }
   0xb   :  { %32 = dma.hbm_to_vmem [thread:$0]  %s25_s18, 1024, %s27_s20, [#allocation7], %s420_s21, %s420_s21, %s421_s22  }
   0xc   :  { %412 = dma.done.wait [#allocation7], 1024  }
   0xd   :  { %413 = vsyncadd [#allocation7], 4294966272  ;;  %s43_s0 = sld [smem:[#allocation5]]  ;;  %v49_v0 = vld [vmem:[#allocation6] sm:$0xff]  ;;  %v81_v5 = vld [vmem:[#allocation6 + $0x8] sm:$0xff]  ;;  %v422_v17 = vmov 0.0  }
   0xe   :  { %s313_s23 = sld [smem:[#allocation5 + $0x1]]  ;;  %v109_v13 = vld [vmem:[#allocation6 + $0x10] sm:$0xff]  ;;  %v137_v26 = vld [vmem:[#allocation6 + $0x18] sm:$0xff]  ;;  %v165_v41 = vld [vmem:[#allocation6 + $0x20] sm:$0xff]  ;;  %s423_s27 = smov [#allocation10]  }
   0xf   :  { %s317_s24 = sld [smem:[#allocation5 + $0x5]]  ;;  %v193_v56 = vld [vmem:[#allocation6 + $0x28] sm:$0xff]  ;;  %s293_s28 = sshll.u32 %s423_s27, 4  ;;  %s294_s28 = int_to_ptr.vmem [resolvable:$true] %s293_s28 }
  0x10   :  { %s316_s25 = sld [smem:[#allocation5 + $0x4]]  ;;  %s295_s4 = sshll.u32 %s625_s3, 4  ;;  %s296_s4 = int_to_ptr.hbm [resolvable:$true] %s295_s4 }
  0x11   :  { %s314_s1 = sld [smem:[#allocation5 + $0x2]]  ;;  %s424_s5 = smov [#allocation9]  }
  0x12   :  { %s315_s26 = sld [smem:[#allocation5 + $0x3]]  ;;  %s280_s6 = sshll.u32 %s424_s5, 4  ;;  %s281_s6 = int_to_ptr.vmem [resolvable:$true] %s280_s6 }
  0x13   :  { %v454_v1 = vstv %s43_s0  ;;  %s282_s9 = sshll.u32 %s624_s2, 4  ;;  %s283_s9 = int_to_ptr.hbm [resolvable:$true] %s282_s9 }
  0x14   :  { %v51_v2 = vmul.f32 %v454_v1, %v49_v0  ;;  %v457_v3 = vstv %s313_s23  ;;  %v82_v9 = vmul.f32 %v81_v5, %v454_v1  ;;  %v110_v20 = vmul.f32 %v109_v13, %v454_v1 }
  0x15   :  { %v462_v7 = vstv %s317_s24  ;;  %v138_v32 = vmul.f32 %v137_v26, %v454_v1  ;;  %v166_v47 = vmul.f32 %v165_v41, %v454_v1  ;;  %v194_v62 = vmul.f32 %v193_v56, %v454_v1 }
  0x16   :  { %v53_v4 = vadd.f32 %v457_v3, %v51_v2  ;;  %v460_v6 = vstv %s316_s25  ;;  %vm318_vm0 = vcmp.lt.f32.partialorder %v462_v7, 0.0  ;;  %v83_v12 = vadd.f32 %v82_v9, %v457_v3 }
  0x17   :  { %v56_v8 = vmul.f32 0.0, %v460_v6  ;;  %v471_v15 = vstv %s314_s1  ;;  %v111_v25 = vadd.f32 %v110_v20, %v457_v3  ;;  %v139_v40 = vadd.f32 %v138_v32, %v457_v3 }
  0x18   :  { %v476_v19 = vstv %s315_s26  ;;  %v167_v55 = vadd.f32 %v166_v47, %v457_v3 }
  0x19   :  { %v57_v10 = vadd.f32 %v56_v8, %v53_v4 }
  0x1b   :  { %v60_v11 = vsub.f32 %v57_v10, %v462_v7 }
  0x1d   :  { %v61_v14 = vsel %vm318_vm0, %v60_v11, %v57_v10  ;;  %v195_v10 = vadd.f32 %v194_v62, %v457_v3  ;;  %v221_v11 = vld [vmem:[#allocation6 + $0x30] sm:$0xff] }
  0x1e   :  { %vm63_vm1 = vcmp.gt.f32.partialorder %v61_v14, %v462_v7  ;;  %v85_v16 = vmul.f32 %v61_v14, %v460_v6  ;;  %v222_v20 = vmul.f32 %v221_v11, %v454_v1 }
  0x1f   :  { %v64_v18 = vsel %vm63_vm1, 1.0, %v422_v17 }
  0x20   :  { %v66_v21 = vmul.f32 %v471_v15, %v64_v18  ;;  %v86_v22 = vadd.f32 %v85_v16, %v83_v12 }
  0x22   :  { %v68_v23 = vadd.f32 %v476_v19, %v66_v21  ;;  %v88_v24 = vsub.f32 %v86_v22, %v462_v7 }
  0x24   :  { %v71_v27 = vadd.f32 %v68_v23, %v56_v8  ;;  %v89_v28 = vsel %vm63_vm1, %v88_v24, %v86_v22 }
  0x25   :  { %vm91_vm2 = vcmp.gt.f32.partialorder %v89_v28, %v462_v7  ;;  %v113_v29 = vmul.f32 %v89_v28, %v460_v6  ;;  %v223_v28 = vadd.f32 %v222_v20, %v457_v3 }
  0x26   :  { %v73_v30 = vsub.f32 %v71_v27, %v462_v7  ;;  %v92_v31 = vsel %vm91_vm2, 1.0, %v422_v17 }
  0x27   :  { %v93_v33 = vmul.f32 %v92_v31, %v471_v15  ;;  %v114_v34 = vadd.f32 %v113_v29, %v111_v25  ;;  %v249_v29 = vld [vmem:[#allocation6 + $0x38] sm:$0xff] }
  0x28   :  { %v74_v35 = vsel %vm318_vm0, %v73_v30, %v71_v27 }
  0x29   :  { %vm76_vm3 = vcmp.gt.f32.partialorder %v74_v35, %v462_v7  ;;  %v94_v36 = vadd.f32 %v93_v33, %v476_v19  ;;  %v96_v37 = vmul.f32 %v74_v35, %v460_v6  ;;  %v116_v38 = vsub.f32 %v114_v34, %v462_v7  ;;  %79 = vst [vmem:[#allocation10] sm:$0xff] %v74_v35 }
  0x2a   :  { %v77_v39 = vsel %vm76_vm3, 1.0, %v422_v17  ;;  %v250_v35 = vmul.f32 %v249_v29, %v454_v1 }
  0x2b   :  { %78 = vst [vmem:[#allocation9] sm:$0xff] %v77_v39  ;;  %v97_v42 = vadd.f32 %v96_v37, %v94_v36  ;;  %v117_v43 = vsel %vm91_vm2, %v116_v38, %v114_v34 }
  0x2c   :  { %v141_v44 = vmul.f32 %v117_v43, %v460_v6  ;;  %vm119_vm4 = vcmp.gt.f32.partialorder %v117_v43, %v462_v7  ;;  %v251_v1 = vadd.f32 %v250_v35, %v457_v3 }
  0x2d   :  { %v99_v45 = vsub.f32 %v97_v42, %v462_v7  ;;  %v120_v46 = vsel %vm119_vm4, 1.0, %v422_v17 }
  0x2e   :  { %v142_v48 = vadd.f32 %v141_v44, %v139_v40  ;;  %v121_v49 = vmul.f32 %v120_v46, %v471_v15 }
  0x2f   :  { %v100_v50 = vsel %vm76_vm3, %v99_v45, %v97_v42 }
  0x30   :  { %vm102_vm5 = vcmp.gt.f32.partialorder %v100_v50, %v462_v7  ;;  %v122_v51 = vadd.f32 %v121_v49, %v476_v19  ;;  %v124_v52 = vmul.f32 %v100_v50, %v460_v6  ;;  %107 = vst [vmem:[#allocation10 + $0x8] sm:$0xff] %v100_v50  ;;  %v144_v53 = vsub.f32 %v142_v48, %v462_v7 }
  0x31   :  { %v103_v54 = vsel %vm102_vm5, 1.0, %v422_v17 }
  0x32   :  { %105 = vst [vmem:[#allocation9 + $0x8] sm:$0xff] %v103_v54  ;;  %v125_v57 = vadd.f32 %v124_v52, %v122_v51  ;;  %v145_v58 = vsel %vm119_vm4, %v144_v53, %v142_v48 }
  0x33   :  { %vm147_vm6 = vcmp.gt.f32.partialorder %v145_v58, %v462_v7  ;;  %v169_v59 = vmul.f32 %v145_v58, %v460_v6 }
  0x34   :  { %v127_v60 = vsub.f32 %v125_v57, %v462_v7  ;;  %v148_v61 = vsel %vm147_vm6, 1.0, %v422_v17 }
  0x35   :  { %v149_v63 = vmul.f32 %v148_v61, %v471_v15  ;;  %v170_v0 = vadd.f32 %v169_v59, %v167_v55 }
  0x36   :  { %v128_v2 = vsel %vm102_vm5, %v127_v60, %v125_v57 }
  0x37   :  { %vm130_vm7 = vcmp.gt.f32.partialorder %v128_v2, %v462_v7  ;;  %v150_v4 = vadd.f32 %v149_v63, %v476_v19  ;;  %v152_v5 = vmul.f32 %v128_v2, %v460_v6  ;;  %135 = vst [vmem:[#allocation10 + $0x10] sm:$0xff] %v128_v2  ;;  %v172_v8 = vsub.f32 %v170_v0, %v462_v7 }
  0x38   :  { %v131_v9 = vsel %vm130_vm7, 1.0, %v422_v17 }
  0x39   :  { %133 = vst [vmem:[#allocation9 + $0x10] sm:$0xff] %v131_v9  ;;  %v153_v12 = vadd.f32 %v152_v5, %v150_v4  ;;  %v173_v13 = vsel %vm147_vm6, %v172_v8, %v170_v0 }
  0x3a   :  { %vm175_vm8 = vcmp.gt.f32.partialorder %v173_v13, %v462_v7  ;;  %v197_v14 = vmul.f32 %v173_v13, %v460_v6 }
  0x3b   :  { %v155_v16 = vsub.f32 %v153_v12, %v462_v7  ;;  %v176_v18 = vsel %vm175_vm8, 1.0, %v422_v17 }
  0x3c   :  { %v177_v21 = vmul.f32 %v176_v18, %v471_v15  ;;  %v198_v22 = vadd.f32 %v197_v14, %v195_v10 }
  0x3d   :  { %v156_v23 = vsel %vm130_vm7, %v155_v16, %v153_v12 }
  0x3e   :  { %vm158_vm9 = vcmp.gt.f32.partialorder %v156_v23, %v462_v7  ;;  %v178_v24 = vadd.f32 %v177_v21, %v476_v19  ;;  %v180_v25 = vmul.f32 %v156_v23, %v460_v6  ;;  %163 = vst [vmem:[#allocation10 + $0x18] sm:$0xff] %v156_v23  ;;  %v200_v26 = vsub.f32 %v198_v22, %v462_v7 }
  0x3f   :  { %v159_v27 = vsel %vm158_vm9, 1.0, %v422_v17 }
  0x40   :  { %161 = vst [vmem:[#allocation9 + $0x18] sm:$0xff] %v159_v27  ;;  %v181_v30 = vadd.f32 %v180_v25, %v178_v24  ;;  %v201_v31 = vsel %vm175_vm8, %v200_v26, %v198_v22 }
  0x41   :  { %vm203_vm10 = vcmp.gt.f32.partialorder %v201_v31, %v462_v7  ;;  %v225_v32 = vmul.f32 %v201_v31, %v460_v6 }
  0x42   :  { %v183_v33 = vsub.f32 %v181_v30, %v462_v7  ;;  %v204_v34 = vsel %vm203_vm10, 1.0, %v422_v17 }
  0x43   :  { %v205_v36 = vmul.f32 %v204_v34, %v471_v15  ;;  %v226_v37 = vadd.f32 %v225_v32, %v223_v28 }
  0x44   :  { %v184_v38 = vsel %vm158_vm9, %v183_v33, %v181_v30 }
  0x45   :  { %vm186_vm11 = vcmp.gt.f32.partialorder %v184_v38, %v462_v7  ;;  %v206_v39 = vadd.f32 %v205_v36, %v476_v19  ;;  %v208_v40 = vmul.f32 %v184_v38, %v460_v6  ;;  %191 = vst [vmem:[#allocation10 + $0x20] sm:$0xff] %v184_v38  ;;  %v228_v41 = vsub.f32 %v226_v37, %v462_v7 }
  0x46   :  { %v187_v42 = vsel %vm186_vm11, 1.0, %v422_v17 }
  0x47   :  { %189 = vst [vmem:[#allocation9 + $0x20] sm:$0xff] %v187_v42  ;;  %v209_v43 = vadd.f32 %v208_v40, %v206_v39  ;;  %v229_v44 = vsel %vm203_vm10, %v228_v41, %v226_v37 }
  0x48   :  { %vm231_vm12 = vcmp.gt.f32.partialorder %v229_v44, %v462_v7  ;;  %v253_v45 = vmul.f32 %v229_v44, %v460_v6 }
  0x49   :  { %v211_v46 = vsub.f32 %v209_v43, %v462_v7  ;;  %v232_v47 = vsel %vm231_vm12, 1.0, %v422_v17 }
  0x4a   :  { %v233_v48 = vmul.f32 %v232_v47, %v471_v15  ;;  %v254_v49 = vadd.f32 %v253_v45, %v251_v1 }
  0x4b   :  { %v212_v50 = vsel %vm186_vm11, %v211_v46, %v209_v43 }
  0x4c   :  { %vm214_vm13 = vcmp.gt.f32.partialorder %v212_v50, %v462_v7  ;;  %v234_v3 = vadd.f32 %v233_v48, %v476_v19  ;;  %v236_v51 = vmul.f32 %v212_v50, %v460_v6  ;;  %219 = vst [vmem:[#allocation10 + $0x28] sm:$0xff] %v212_v50  ;;  %v256_v52 = vsub.f32 %v254_v49, %v462_v7 }
  0x4d   :  { %v215_v53 = vsel %vm214_vm13, 1.0, %v422_v17 }
  0x4e   :  { %217 = vst [vmem:[#allocation9 + $0x28] sm:$0xff] %v215_v53  ;;  %v237_v54 = vadd.f32 %v236_v51, %v234_v3  ;;  %v257_v55 = vsel %vm231_vm12, %v256_v52, %v254_v49 }
  0x4f   :  { %vm259_vm14 = vcmp.gt.f32.partialorder %v257_v55, %v462_v7 }
  0x50   :  { %v239_v56 = vsub.f32 %v237_v54, %v462_v7  ;;  %v260_v57 = vsel %vm259_vm14, 1.0, %v422_v17 }
  0x51   :  { %v261_v58 = vmul.f32 %v260_v57, %v471_v15 }
  0x52   :  { %v240_v59 = vsel %vm214_vm13, %v239_v56, %v237_v54 }
  0x53   :  { %vm242_vm15 = vcmp.gt.f32.partialorder %v240_v59, %v462_v7  ;;  %v264_v60 = vmul.f32 %v240_v59, %v460_v6  ;;  %247 = vst [vmem:[#allocation10 + $0x30] sm:$0xff] %v240_v59  ;;  %v262_v61 = vadd.f32 %v261_v58, %v476_v19 }
  0x54   :  { %v243_v62 = vsel %vm242_vm15, 1.0, %v422_v17 }
  0x55   :  { %245 = vst [vmem:[#allocation9 + $0x30] sm:$0xff] %v243_v62  ;;  %v265_v63 = vadd.f32 %v264_v60, %v262_v61 }
  0x57   :  { %v267_v15 = vsub.f32 %v265_v63, %v462_v7 }
  0x59   :  { %v268_v6 = vsel %vm242_vm15, %v267_v15, %v265_v63 }
  0x5a   :  { %vm270_vm0 = vcmp.gt.f32.partialorder %v268_v6, %v462_v7  ;;  %275 = vst [vmem:[#allocation10 + $0x38] sm:$0xff] %v268_v6 }
  0x5b   :  { %v271_v19 = vsel %vm270_vm0, 1.0, %v422_v17  ;;  %301 = dma.vmem_to_hbm [thread:$0]  %s294_s28, 1024, %s296_s4, [#allocation11], %s420_s21, %s420_s21, %s421_s22  }
  0x5c   :  { %273 = vst [vmem:[#allocation9 + $0x38] sm:$0xff] %v271_v19 }
  0x5d   :  { %288 = dma.vmem_to_hbm [thread:$0]  %s281_s6, 1024, %s283_s9, [#allocation8], %s420_s21, %s420_s21, %s421_s22  }
  0x5e   :  { %414 = dma.done.wait [#allocation8], 1024  }
  0x5f   :  { %415 = vsyncadd [#allocation8], 4294966272 }
  0x60   :  { %416 = dma.done.wait [#allocation11], 1024  }
  0x61   :  { %417 = vsyncadd [#allocation11], 4294966272 }
  0x62   :  { %310 = vsyncpa [#allocation7], 1 }
  0x63   :  { %311 = vsyncpa [#allocation8], 1 }
  0x64   :  { %312 = vsyncpa [#allocation11], 1 }

</bundles_post_ra>
